<compile_context>
chip_gen: v6e
topology: v6e:2x2x1
jax: 0.10.0
libtpu: 0.0.40
codegen_flags: <defaults>
</compile_context>

<pallas_src>
import math

import jax
import jax.numpy as jnp
from jax.experimental import pallas as pl
from jax.experimental.pallas import tpu as pltpu

# ---- constants from the original module ----
MAX_VARIANCE = math.exp(0.5)    # -> max_logvar = 0.5
MIN_VARIANCE = math.exp(-10.0)  # -> min_logvar = -10.0

# Multiple of 8 (f32 sublane tiling) and 16 (bf16 packed sublane tiling).
_SUBLANE_GRAN = 16


def _softplus(x):
    # numerically stable softplus; lowers to EUP exp/log ops
    return jnp.logaddexp(x, 0.0)


def _round_up(v, m):
    return ((v + m - 1) // m) * m


def _choose_tile_n(N, tile_n):
    """Pick the N-tile size.

    * large tiles amortize the ~0.35us/step pipeline overhead
    * multiple of the sublane granularity unless the tile covers all of N
    * if the problem would fit in one step but N is large enough, split into
      >= 2 steps so the 'parallel' axis shards across both TCs on v7x.
    """
    if N <= 0:
        return 1
    tn = min(tile_n, N)
    if tn >= N:
        if N >= 2 * _SUBLANE_GRAN:
            tn = _round_up(-(-N // 2), _SUBLANE_GRAN)   # >=2 grid steps (megacore)
        else:
            tn = N   # single step; block == full dim satisfies the tiling rule
    else:
        tn = max(_SUBLANE_GRAN, (tn // _SUBLANE_GRAN) * _SUBLANE_GRAN)
    return tn


def _make_kernel(n_layers, half_lanes, matmul_dtype):
    """Per-N-tile forward over the ensemble-packed (lane-packed) layout.

    Ref order:
      x_packed, (w_0, b_0), ..., (w_{L-1}, b_{L-1}),
      max_logvar_lane, min_logvar_lane, mean_out, var_out

    Weights are block-diagonal over the ensemble (E*d_in, E*d_out) and already
    in matmul_dtype (cast on the host).  Biases / logvar bounds stay f32.

    NOTE: on a padded tail N-tile, the padded rows run tanh/softplus/exp on
    garbage values; this is harmless because those rows are masked on writeback.
    """
    def kernel(*refs):
        x_ref = refs[0]
        wb_refs = refs[1:1 + 2 * n_layers]
        maxlv_ref = refs[1 + 2 * n_layers]
        minlv_ref = refs[2 + 2 * n_layers]
        mean_ref = refs[3 + 2 * n_layers]
        var_ref = refs[4 + 2 * n_layers]

        h = x_ref[...]                                    # (tn, E*F) matmul_dtype
        for j in range(n_layers):
            w = wb_refs[2 * j][...]                       # (E*d_in, E*d_out) matmul_dtype
            b = wb_refs[2 * j + 1][...]                   # (1, E*d_out) f32
            h = jnp.dot(h, w, preferred_element_type=jnp.float32) + b   # f32
            if j != n_layers - 1:
                h = jnp.tanh(h)                           # f32 elementwise (v5e-safe)
                if h.dtype != matmul_dtype:
                    h = h.astype(matmul_dtype)            # operand cast only

        # h is (tn, 2*E*od) with lanes = [all means | all logvars] (host-permuted
        # final-layer columns).  Clamp/exp only on the logvar half.
        mean_ref[...] = h[:, :half_lanes].astype(mean_ref.dtype)

        lv = h[:, half_lanes:]
        max_lv = maxlv_ref[...]                           # (1, E*od) f32
        min_lv = minlv_ref[...]                           # (1, E*od) f32
        lv = max_lv - _softplus(max_lv - lv)
        lv = min_lv + _softplus(lv - min_lv)
        var_ref[...] = jnp.exp(lv).astype(var_ref.dtype)

    return kernel


def _pack_params(params, matmul_dtype):
    """Host-side prep (runs once per parameter set, plain XLA):

      * fold standardization into layer 0:
            W0' = diag(1/(sigma+eps)) @ W0,  b0' = b0 - (mu/(sigma+eps)) @ W0
      * build block-diagonal ensemble-packed weights (E*d_in, E*d_out)
      * permute the final layer's columns so the packed output lane layout is
        [e0 mean | e1 mean | ... | e0 logvar | e1 logvar | ...]
      * cast packed weights to matmul_dtype (bf16 recommended); biases and
        logvar bounds stay f32 (elementwise math is f32 in-kernel)
      * lane-expand max/min logvar over the logvar half: (1, E*od)
    """
    weights = [jnp.asarray(w, jnp.float32) for w in params["weights"]]
    biases = [jnp.asarray(b, jnp.float32) for b in params["biases"]]
    E = weights[0].shape[0]
    od = params["max_logvar"].shape[-1]

    inv_sigma = 1.0 / (params["sigma"].astype(jnp.float32) + 1e-10)   # (1, F)
    shift = (params["mu"].astype(jnp.float32) * inv_sigma)[0]         # (F,)
    w0 = weights[0] * inv_sigma[0][None, :, None]                     # scaled rows
    b0 = biases[0] - jnp.einsum("f,efo->eo", shift, weights[0])       # uses original W0
    weights[0] = w0
    biases[0] = b0

    eye = jnp.eye(E, dtype=jnp.float32)
    packed_w, packed_b = [], []
    for w, b in zip(weights, biases):
        _, din, dout = w.shape
        # Wbd[e*din + i, f*dout + o] = w[e, i, o] * (e == f)
        wbd = (w[:, :, None, :] * eye[:, None, :, None]).reshape(E * din, E * dout)
        packed_w.append(wbd)
        packed_b.append(b.reshape(1, E * dout))

    # Final layer column permutation: [means (member-major) | logvars].
    two_od = 2 * od
    mean_cols = (jnp.arange(E)[:, None] * two_od + jnp.arange(od)[None, :]).reshape(-1)
    lv_cols = mean_cols + od
    perm = jnp.concatenate([mean_cols, lv_cols])
    packed_w[-1] = packed_w[-1][:, perm]
    packed_b[-1] = packed_b[-1][:, perm]

    packed_w = [w.astype(matmul_dtype) for w in packed_w]   # MXU operands only

    maxlv_lane = jnp.tile(params["max_logvar"].astype(jnp.float32), (1, E))  # (1, E*od)
    minlv_lane = jnp.tile(params["min_logvar"].astype(jnp.float32), (1, E))
    return packed_w, packed_b, maxlv_lane, minlv_lane, od


def ensemble_model_forward_packed(x, params, *, tile_n=2048,
                                  matmul_dtype=jnp.bfloat16,
                                  single_buffer_consts=True):
    """Forward pass, returning LANE-PACKED outputs (preferred for consumers):

        mean_packed, var_packed : (N, E*output_dim) float32
        lanes are member-major: [e0 od | e1 od | ... | e{E-1} od]

    Use unpack_ensemble_output() only where the (E, N, od) layout is truly
    needed — the unpack is an extra HBM round trip.
    """
    E, N, F = x.shape
    packed_w, packed_b, maxlv_lane, minlv_lane, od = _pack_params(params, matmul_dtype)
    n_layers = len(packed_w)
    half = E * od

    # Lane-pack the ensemble: (E, N, F) -> (N, E*F); row n lanes [e*F:(e+1)*F]
    # hold member e's input.  Cast to matmul_dtype on the host.
    x_packed = jnp.transpose(x, (1, 0, 2)).reshape(N, E * F).astype(matmul_dtype)

    tn = _choose_tile_n(N, tile_n)
    grid = (pl.cdiv(N, tn),)

    flat_wb = []
    for w, b in zip(packed_w, packed_b):
        flat_wb.extend([w, b])

    def _call(use_single_buffer):
        def resident_spec(shape):
            # Constant index_map -> the block never changes; a second pipeline
            # buffer is useless.  Guarded: older jax may not accept Buffered(1).
            if use_single_buffer and hasattr(pl, "Buffered"):
                try:
                    return pl.BlockSpec(shape, lambda i: (0, 0),
                                        pipeline_mode=pl.Buffered(1))
                except (TypeError, ValueError):
                    pass
            return pl.BlockSpec(shape, lambda i: (0, 0))

        in_specs = [pl.BlockSpec((tn, E * F), lambda i: (i, 0))]
        for w, b in zip(packed_w, packed_b):
            in_specs.append(resident_spec(w.shape))
            in_specs.append(resident_spec(b.shape))
        in_specs.append(resident_spec(maxlv_lane.shape))
        in_specs.append(resident_spec(minlv_lane.shape))

        out_specs = (pl.BlockSpec((tn, half), lambda i: (i, 0)),
                     pl.BlockSpec((tn, half), lambda i: (i, 0)))
        out_shape = (jax.ShapeDtypeStruct((N, half), jnp.float32),
                     jax.ShapeDtypeStruct((N, half), jnp.float32))

        kernel = _make_kernel(n_layers, half, matmul_dtype)

        return pl.pallas_call(
            kernel,
            out_shape=out_shape,
            grid_spec=pltpu.PrefetchScalarGridSpec(
                num_scalar_prefetch=0,
                grid=grid,
                in_specs=in_specs,
                out_specs=out_specs,
            ),
            compiler_params=pltpu.CompilerParams(
                dimension_semantics=("parallel",),   # N-tiles independent (megacore)
                # vmem_limit_bytes intentionally omitted: footprint at the
                # default tile size is ~2 MiB, far under the scoped default.
            ),
        )(x_packed, *flat_wb, maxlv_lane, minlv_lane)

    if single_buffer_consts:
        try:
            return _call(True)
        except Exception:   # pl.Buffered(1) unsupported on this jax -> retry plain
            return _call(False)
    return _call(False)


def unpack_ensemble_output(packed, ensemble_size, output_dim):
    """(N, E*od) lane-packed -> (E, N, od). Extra HBM pass; use only if needed."""
    N = packed.shape[0]
    return jnp.transpose(packed.reshape(N, ensemble_size, output_dim), (1, 0, 2))


def ensemble_model_forward(x, params, *, tile_n=2048,
                           matmul_dtype=jnp.bfloat16,
                           single_buffer_consts=True):
    """Module-compatible forward (ret_log_var=False): returns (mean, var) with
    shape (E, N, output_dim).  Perf-sensitive callers should prefer
    ensemble_model_forward_packed() and keep the packed layout downstream."""
    E = x.shape[0]
    od = params["max_logvar"].shape[-1]
    mean_p, var_p = ensemble_model_forward_packed(
        x, params, tile_n=tile_n, matmul_dtype=matmul_dtype,
        single_buffer_consts=single_buffer_consts)
    return (unpack_ensemble_output(mean_p, E, od),
            unpack_ensemble_output(var_p, E, od))


def init_params(key, state_size, action_size, ensemble_size, hidden_sizes):
    """Deterministic synthetic init mirroring init_weights (truncated normal,
    std = 1/(2*sqrt(in_features)), zero biases).  mu/sigma get non-trivial
    values (as a fitted input scaler would) to exercise the standardization fold."""
    in_features = state_size + action_size
    layer_sizes = (in_features,) + tuple(hidden_sizes) + (2 * state_size,)
    weights, biases = [], []
    for j in range(len(layer_sizes) - 1):
        key, wk = jax.random.split(key)
        d_in, d_out = layer_sizes[j], layer_sizes[j + 1]
        std = 1.0 / (2.0 * math.sqrt(d_in))
        w = std * jax.random.truncated_normal(
            wk, -2.0, 2.0, (ensemble_size, d_in, d_out), dtype=jnp.float32)
        b = jnp.zeros((ensemble_size, d_out), dtype=jnp.float32)
        weights.append(w)
        biases.append(b)
    key, mk, sk = jax.random.split(key, 3)
    mu = 0.3 * jax.random.normal(mk, (1, in_features), dtype=jnp.float32)
    sigma = 1.0 + 0.2 * jax.random.uniform(sk, (1, in_features), dtype=jnp.float32)
    return dict(
        mu=mu,
        sigma=sigma,
        max_logvar=jnp.full((1, state_size), math.log(MAX_VARIANCE), jnp.float32),
        min_logvar=jnp.full((1, state_size), math.log(MIN_VARIANCE), jnp.float32),
        weights=weights,
        biases=biases,
    )


def reference_forward(x, params):
    """Pure-JAX reference of EnsembleModel.forward (ret_log_var=False)."""
    h = (x - params["mu"][None]) / (params["sigma"][None] + 1e-10)
    n_layers = len(params["weights"])
    for j, (w, b) in enumerate(zip(params["weights"], params["biases"])):
        h = jnp.einsum("enf,efo->eno", h, w) + b[:, None, :]
        if j != n_layers - 1:
            h = jnp.tanh(h)
    out_dim = params["max_logvar"].shape[-1]
    mean = h[:, :, :out_dim]
    logvar = h[:, :, out_dim:]
    logvar = params["max_logvar"] - jax.nn.softplus(params["max_logvar"] - logvar)
    logvar = params["min_logvar"] + jax.nn.softplus(logvar - params["min_logvar"])
    return mean, jnp.exp(logvar)


# TODO(synk): loss/train/get_decay_loss/optimizer are training utilities with no
# kernel equivalent here; only forward(ret_log_var=False) is implemented.

if __name__ == "__main__":
    state_size = 4
    action_size = 4
    ensemble_size = 4
    hidden_sizes = (32, 32)

    key = jax.random.PRNGKey(0)
    key, pkey = jax.random.split(key)
    params = init_params(pkey, state_size, action_size, ensemble_size, hidden_sizes)

    def check(N, matmul_dtype, atol, rtol):
        global key
        key, xkey = jax.random.split(key)
        x = jax.random.normal(
            xkey, (ensemble_size, N, state_size + action_size), dtype=jnp.float32)
        mean, var = ensemble_model_forward(x, params, matmul_dtype=matmul_dtype)
        jax.block_until_ready((mean, var))
        mean_ref, var_ref = reference_forward(x, params)
        assert mean.shape == mean_ref.shape and var.shape == var_ref.shape
        assert jnp.allclose(mean, mean_ref, atol=atol, rtol=rtol), "mean mismatch"
        assert jnp.allclose(var, var_ref, atol=atol, rtol=rtol), "var mismatch"

    # Default config (bf16 MXU operands) at the small demo size: relaxed tol.
    check(N=8, matmul_dtype=jnp.bfloat16, atol=2e-2, rtol=2e-2)
    # Exact-path sanity check (f32 operands) at tight tolerance.
    check(N=8, matmul_dtype=jnp.float32, atol=1e-4, rtol=1e-4)
    # Multi-step grid (megacore split + padded tail tile) correctness check.
    check(N=40, matmul_dtype=jnp.bfloat16, atol=2e-2, rtol=2e-2)

    print("KERNEL_OK")
</pallas_src>

<mosaic_0001>
module attributes {stable_mosaic.version = 11 : i64} {
  func.func @kernel(%arg0: i32, %arg1: memref<8x32xbf16, #tpu.memory_space<vmem>>, %arg2: memref<32x128xbf16, #tpu.memory_space<vmem>>, %arg3: memref<1x128xf32, #tpu.memory_space<vmem>>, %arg4: memref<128x128xbf16, #tpu.memory_space<vmem>>, %arg5: memref<1x128xf32, #tpu.memory_space<vmem>>, %arg6: memref<128x32xbf16, #tpu.memory_space<vmem>>, %arg7: memref<1x32xf32, #tpu.memory_space<vmem>>, %arg8: memref<1x16xf32, #tpu.memory_space<vmem>>, %arg9: memref<1x16xf32, #tpu.memory_space<vmem>>, %arg10: memref<8x16xf32, #tpu.memory_space<vmem>>, %arg11: memref<8x16xf32, #tpu.memory_space<vmem>>) attributes {dimension_semantics = [#tpu.dimension_semantics<parallel>], iteration_bounds = array<i64: 1>, scalar_prefetch = 0 : i64, scratch_operands = 0 : i64, tpu.core_type = #tpu.core_type<tc>, window_params = [{transform_indices = @transform_0, window_bounds = array<i64: 8, 32>}, {pipeline_mode = #tpu.pipeline_mode<synchronous>, transform_indices = @transform_1, window_bounds = array<i64: 32, 128>}, {pipeline_mode = #tpu.pipeline_mode<synchronous>, transform_indices = @transform_2, window_bounds = array<i64: 1, 128>}, {pipeline_mode = #tpu.pipeline_mode<synchronous>, transform_indices = @transform_3, window_bounds = array<i64: 128, 128>}, {pipeline_mode = #tpu.pipeline_mode<synchronous>, transform_indices = @transform_4, window_bounds = array<i64: 1, 128>}, {pipeline_mode = #tpu.pipeline_mode<synchronous>, transform_indices = @transform_5, window_bounds = array<i64: 128, 32>}, {pipeline_mode = #tpu.pipeline_mode<synchronous>, transform_indices = @transform_6, window_bounds = array<i64: 1, 32>}, {pipeline_mode = #tpu.pipeline_mode<synchronous>, transform_indices = @transform_7, window_bounds = array<i64: 1, 16>}, {pipeline_mode = #tpu.pipeline_mode<synchronous>, transform_indices = @transform_8, window_bounds = array<i64: 1, 16>}, {transform_indices = @transform_9, window_bounds = array<i64: 8, 16>}, {transform_indices = @transform_10, window_bounds = array<i64: 8, 16>}]} {
    %c0 = arith.constant 0 : index
    %c0_0 = arith.constant 0 : index
    %0 = vector.load %arg1[%c0, %c0_0] : memref<8x32xbf16, #tpu.memory_space<vmem>>, vector<8x32xbf16>
    %c0_1 = arith.constant 0 : index
    %c0_2 = arith.constant 0 : index
    %1 = vector.load %arg2[%c0_1, %c0_2] : memref<32x128xbf16, #tpu.memory_space<vmem>>, vector<32x128xbf16>
    %c0_3 = arith.constant 0 : index
    %c0_4 = arith.constant 0 : index
    %2 = vector.load %arg3[%c0_3, %c0_4] : memref<1x128xf32, #tpu.memory_space<vmem>>, vector<1x128xf32>
    %cst = arith.constant dense<0.000000e+00> : vector<8x128xf32>
    %3 = tpu.matmul %0, %1, %cst {dimension_numbers = #tpu.dot_dimension_numbers<[1], [0], [0], [1], [0, 0, 1, 1], [], []>} : vector<8x32xbf16>, vector<32x128xbf16>, vector<8x128xf32> -> vector<8x128xf32>
    %4 = vector.broadcast %2 : vector<1x128xf32> to vector<8x128xf32>
    %5 = arith.addf %3, %4 : vector<8x128xf32>
    %6 = math.tanh %5 : vector<8x128xf32>
    %7 = arith.truncf %6 : vector<8x128xf32> to vector<8x128xbf16>
    %c0_5 = arith.constant 0 : index
    %c0_6 = arith.constant 0 : index
    %8 = vector.load %arg4[%c0_5, %c0_6] : memref<128x128xbf16, #tpu.memory_space<vmem>>, vector<128x128xbf16>
    %c0_7 = arith.constant 0 : index
    %c0_8 = arith.constant 0 : index
    %9 = vector.load %arg5[%c0_7, %c0_8] : memref<1x128xf32, #tpu.memory_space<vmem>>, vector<1x128xf32>
    %cst_9 = arith.constant dense<0.000000e+00> : vector<8x128xf32>
    %10 = tpu.matmul %7, %8, %cst_9 {dimension_numbers = #tpu.dot_dimension_numbers<[1], [0], [0], [1], [0, 0, 1, 1], [], []>} : vector<8x128xbf16>, vector<128x128xbf16>, vector<8x128xf32> -> vector<8x128xf32>
    %11 = vector.broadcast %9 : vector<1x128xf32> to vector<8x128xf32>
    %12 = arith.addf %10, %11 : vector<8x128xf32>
    %13 = math.tanh %12 : vector<8x128xf32>
    %14 = arith.truncf %13 : vector<8x128xf32> to vector<8x128xbf16>
    %c0_10 = arith.constant 0 : index
    %c0_11 = arith.constant 0 : index
    %15 = vector.load %arg6[%c0_10, %c0_11] : memref<128x32xbf16, #tpu.memory_space<vmem>>, vector<128x32xbf16>
    %c0_12 = arith.constant 0 : index
    %c0_13 = arith.constant 0 : index
    %16 = vector.load %arg7[%c0_12, %c0_13] : memref<1x32xf32, #tpu.memory_space<vmem>>, vector<1x32xf32>
    %cst_14 = arith.constant dense<0.000000e+00> : vector<8x32xf32>
    %17 = tpu.matmul %14, %15, %cst_14 {dimension_numbers = #tpu.dot_dimension_numbers<[1], [0], [0], [1], [0, 0, 1, 1], [], []>} : vector<8x128xbf16>, vector<128x32xbf16>, vector<8x32xf32> -> vector<8x32xf32>
    %18 = vector.broadcast %16 : vector<1x32xf32> to vector<8x32xf32>
    %19 = arith.addf %17, %18 : vector<8x32xf32>
    %20 = vector.extract_strided_slice %19 {offsets = [0, 0], sizes = [8, 16], strides = [1, 1]} : vector<8x32xf32> to vector<8x16xf32>
    %c0_15 = arith.constant 0 : index
    %c0_16 = arith.constant 0 : index
    %21 = vector.load %arg10[%c0_15, %c0_16] : memref<8x16xf32, #tpu.memory_space<vmem>>, vector<8x16xf32>
    tpu.vector_store %arg10[%c0_15, %c0_16], %20 {strides = array<i32>} : memref<8x16xf32, #tpu.memory_space<vmem>>, vector<8x16xf32>,
    %22 = vector.extract_strided_slice %19 {offsets = [0, 16], sizes = [8, 16], strides = [1, 1]} : vector<8x32xf32> to vector<8x16xf32>
    %c0_17 = arith.constant 0 : index
    %c0_18 = arith.constant 0 : index
    %23 = vector.load %arg8[%c0_17, %c0_18] : memref<1x16xf32, #tpu.memory_space<vmem>>, vector<1x16xf32>
    %c0_19 = arith.constant 0 : index
    %c0_20 = arith.constant 0 : index
    %24 = vector.load %arg9[%c0_19, %c0_20] : memref<1x16xf32, #tpu.memory_space<vmem>>, vector<1x16xf32>
    %25 = vector.broadcast %23 : vector<1x16xf32> to vector<8x16xf32>
    %26 = arith.subf %25, %22 : vector<8x16xf32>
    %cst_21 = arith.constant 0.000000e+00 : f32
    %27 = vector.broadcast %cst_21 : f32 to vector<8x16xf32>
    %28 = arith.maximumf %26, %27 : vector<8x16xf32>
    %29 = vector.broadcast %cst_21 : f32 to vector<8x16xf32>
    %30 = arith.subf %26, %29 : vector<8x16xf32>
    %31 = arith.cmpf one, %30, %30 : vector<8x16xf32>
    %32 = vector.broadcast %cst_21 : f32 to vector<8x16xf32>
    %33 = arith.addf %26, %32 : vector<8x16xf32>
    %34 = math.absf %30 : vector<8x16xf32>
    %cst_22 = arith.constant 0.000000e+00 : f32
    %35 = vector.broadcast %cst_22 : f32 to vector<8x16xf32>
    %36 = arith.subf %35, %34 : vector<8x16xf32>
    %37 = math.exp %36 : vector<8x16xf32>
    %38 = math.log1p %37 : vector<8x16xf32>
    %39 = arith.addf %28, %38 : vector<8x16xf32>
    %40 = arith.select %31, %33, %39 : vector<8x16xi1>, vector<8x16xf32>
    %41 = vector.broadcast %23 : vector<1x16xf32> to vector<8x16xf32>
    %42 = arith.subf %41, %40 : vector<8x16xf32>
    %43 = vector.broadcast %24 : vector<1x16xf32> to vector<8x16xf32>
    %44 = arith.subf %42, %43 : vector<8x16xf32>
    %cst_23 = arith.constant 0.000000e+00 : f32
    %45 = vector.broadcast %cst_23 : f32 to vector<8x16xf32>
    %46 = arith.maximumf %44, %45 : vector<8x16xf32>
    %47 = vector.broadcast %cst_23 : f32 to vector<8x16xf32>
    %48 = arith.subf %44, %47 : vector<8x16xf32>
    %49 = arith.cmpf one, %48, %48 : vector<8x16xf32>
    %50 = vector.broadcast %cst_23 : f32 to vector<8x16xf32>
    %51 = arith.addf %44, %50 : vector<8x16xf32>
    %52 = math.absf %48 : vector<8x16xf32>
    %cst_24 = arith.constant 0.000000e+00 : f32
    %53 = vector.broadcast %cst_24 : f32 to vector<8x16xf32>
    %54 = arith.subf %53, %52 : vector<8x16xf32>
    %55 = math.exp %54 : vector<8x16xf32>
    %56 = math.log1p %55 : vector<8x16xf32>
    %57 = arith.addf %46, %56 : vector<8x16xf32>
    %58 = arith.select %49, %51, %57 : vector<8x16xi1>, vector<8x16xf32>
    %59 = vector.broadcast %24 : vector<1x16xf32> to vector<8x16xf32>
    %60 = arith.addf %59, %58 : vector<8x16xf32>
    %61 = math.exp %60 : vector<8x16xf32>
    %c0_25 = arith.constant 0 : index
    %c0_26 = arith.constant 0 : index
    %62 = vector.load %arg11[%c0_25, %c0_26] : memref<8x16xf32, #tpu.memory_space<vmem>>, vector<8x16xf32>
    tpu.vector_store %arg11[%c0_25, %c0_26], %61 {strides = array<i32>} : memref<8x16xf32, #tpu.memory_space<vmem>>, vector<8x16xf32>,
    return
  }
  func.func @transform_0(%arg0: i32) -> (i32, i32) {
    %c0_i32 = arith.constant 0 : i32
    %c0_i32_0 = arith.constant 0 : i32
    return %arg0, %c0_i32 : i32, i32
  }
  func.func @transform_1(%arg0: i32) -> (i32, i32) {
    %c0_i32 = arith.constant 0 : i32
    %c0_i32_0 = arith.constant 0 : i32
    %c0_i32_1 = arith.constant 0 : i32
    return %c0_i32, %c0_i32_0 : i32, i32
  }
  func.func @transform_2(%arg0: i32) -> (i32, i32) {
    %c0_i32 = arith.constant 0 : i32
    %c0_i32_0 = arith.constant 0 : i32
    %c0_i32_1 = arith.constant 0 : i32
    return %c0_i32, %c0_i32_0 : i32, i32
  }
  func.func @transform_3(%arg0: i32) -> (i32, i32) {
    %c0_i32 = arith.constant 0 : i32
    %c0_i32_0 = arith.constant 0 : i32
    %c0_i32_1 = arith.constant 0 : i32
    return %c0_i32, %c0_i32_0 : i32, i32
  }
  func.func @transform_4(%arg0: i32) -> (i32, i32) {
    %c0_i32 = arith.constant 0 : i32
    %c0_i32_0 = arith.constant 0 : i32
    %c0_i32_1 = arith.constant 0 : i32
    return %c0_i32, %c0_i32_0 : i32, i32
  }
  func.func @transform_5(%arg0: i32) -> (i32, i32) {
    %c0_i32 = arith.constant 0 : i32
    %c0_i32_0 = arith.constant 0 : i32
    %c0_i32_1 = arith.constant 0 : i32
    return %c0_i32, %c0_i32_0 : i32, i32
  }
  func.func @transform_6(%arg0: i32) -> (i32, i32) {
    %c0_i32 = arith.constant 0 : i32
    %c0_i32_0 = arith.constant 0 : i32
    %c0_i32_1 = arith.constant 0 : i32
    return %c0_i32, %c0_i32_0 : i32, i32
  }
  func.func @transform_7(%arg0: i32) -> (i32, i32) {
    %c0_i32 = arith.constant 0 : i32
    %c0_i32_0 = arith.constant 0 : i32
    %c0_i32_1 = arith.constant 0 : i32
    return %c0_i32, %c0_i32_0 : i32, i32
  }
  func.func @transform_8(%arg0: i32) -> (i32, i32) {
    %c0_i32 = arith.constant 0 : i32
    %c0_i32_0 = arith.constant 0 : i32
    %c0_i32_1 = arith.constant 0 : i32
    return %c0_i32, %c0_i32_0 : i32, i32
  }
  func.func @transform_9(%arg0: i32) -> (i32, i32) {
    %c0_i32 = arith.constant 0 : i32
    %c0_i32_0 = arith.constant 0 : i32
    return %arg0, %c0_i32 : i32, i32
  }
  func.func @transform_10(%arg0: i32) -> (i32, i32) {
    %c0_i32 = arith.constant 0 : i32
    %c0_i32_0 = arith.constant 0 : i32
    return %arg0, %c0_i32 : i32, i32
  }
}

module attributes {stable_mosaic.version = 11 : i64} {
  func.func @kernel(%arg0: i32, %arg1: memref<8x32xbf16, #tpu.memory_space<vmem>>, %arg2: memref<32x128xbf16, #tpu.memory_space<vmem>>, %arg3: memref<1x128xf32, #tpu.memory_space<vmem>>, %arg4: memref<128x128xbf16, #tpu.memory_space<vmem>>, %arg5: memref<1x128xf32, #tpu.memory_space<vmem>>, %arg6: memref<128x32xbf16, #tpu.memory_space<vmem>>, %arg7: memref<1x32xf32, #tpu.memory_space<vmem>>, %arg8: memref<1x16xf32, #tpu.memory_space<vmem>>, %arg9: memref<1x16xf32, #tpu.memory_space<vmem>>, %arg10: memref<8x16xf32, #tpu.memory_space<vmem>>, %arg11: memref<8x16xf32, #tpu.memory_space<vmem>>) attributes {dimension_semantics = [#tpu.dimension_semantics<parallel>], iteration_bounds = array<i64: 1>, scalar_prefetch = 0 : i64, scratch_operands = 0 : i64, tpu.core_type = #tpu.core_type<tc>, window_params = [{transform_indices = @transform_0, window_bounds = array<i64: 8, 32>}, {pipeline_mode = #tpu.pipeline_mode<synchronous>, transform_indices = @transform_1, window_bounds = array<i64: 32, 128>}, {pipeline_mode = #tpu.pipeline_mode<synchronous>, transform_indices = @transform_2, window_bounds = array<i64: 1, 128>}, {pipeline_mode = #tpu.pipeline_mode<synchronous>, transform_indices = @transform_3, window_bounds = array<i64: 128, 128>}, {pipeline_mode = #tpu.pipeline_mode<synchronous>, transform_indices = @transform_4, window_bounds = array<i64: 1, 128>}, {pipeline_mode = #tpu.pipeline_mode<synchronous>, transform_indices = @transform_5, window_bounds = array<i64: 128, 32>}, {pipeline_mode = #tpu.pipeline_mode<synchronous>, transform_indices = @transform_6, window_bounds = array<i64: 1, 32>}, {pipeline_mode = #tpu.pipeline_mode<synchronous>, transform_indices = @transform_7, window_bounds = array<i64: 1, 16>}, {pipeline_mode = #tpu.pipeline_mode<synchronous>, transform_indices = @transform_8, window_bounds = array<i64: 1, 16>}, {transform_indices = @transform_9, window_bounds = array<i64: 8, 16>}, {transform_indices = @transform_10, window_bounds = array<i64: 8, 16>}]} {
    %c0 = arith.constant 0 : index
    %c0_0 = arith.constant 0 : index
    %0 = vector.load %arg1[%c0, %c0_0] : memref<8x32xbf16, #tpu.memory_space<vmem>>, vector<8x32xbf16>
    %c0_1 = arith.constant 0 : index
    %c0_2 = arith.constant 0 : index
    %1 = vector.load %arg2[%c0_1, %c0_2] : memref<32x128xbf16, #tpu.memory_space<vmem>>, vector<32x128xbf16>
    %c0_3 = arith.constant 0 : index
    %c0_4 = arith.constant 0 : index
    %2 = vector.load %arg3[%c0_3, %c0_4] : memref<1x128xf32, #tpu.memory_space<vmem>>, vector<1x128xf32>
    %cst = arith.constant dense<0.000000e+00> : vector<8x128xf32>
    %3 = tpu.matmul %0, %1, %cst {dimension_numbers = #tpu.dot_dimension_numbers<[1], [0], [0], [1], [0, 0, 1, 1], [], []>} : vector<8x32xbf16>, vector<32x128xbf16>, vector<8x128xf32> -> vector<8x128xf32>
    %4 = vector.broadcast %2 : vector<1x128xf32> to vector<8x128xf32>
    %5 = arith.addf %3, %4 : vector<8x128xf32>
    %6 = math.tanh %5 : vector<8x128xf32>
    %7 = arith.truncf %6 : vector<8x128xf32> to vector<8x128xbf16>
    %c0_5 = arith.constant 0 : index
    %c0_6 = arith.constant 0 : index
    %8 = vector.load %arg4[%c0_5, %c0_6] : memref<128x128xbf16, #tpu.memory_space<vmem>>, vector<128x128xbf16>
    %c0_7 = arith.constant 0 : index
    %c0_8 = arith.constant 0 : index
    %9 = vector.load %arg5[%c0_7, %c0_8] : memref<1x128xf32, #tpu.memory_space<vmem>>, vector<1x128xf32>
    %cst_9 = arith.constant dense<0.000000e+00> : vector<8x128xf32>
    %10 = tpu.matmul %7, %8, %cst_9 {dimension_numbers = #tpu.dot_dimension_numbers<[1], [0], [0], [1], [0, 0, 1, 1], [], []>} : vector<8x128xbf16>, vector<128x128xbf16>, vector<8x128xf32> -> vector<8x128xf32>
    %11 = vector.broadcast %9 : vector<1x128xf32> to vector<8x128xf32>
    %12 = arith.addf %10, %11 : vector<8x128xf32>
    %13 = math.tanh %12 : vector<8x128xf32>
    %14 = arith.truncf %13 : vector<8x128xf32> to vector<8x128xbf16>
    %c0_10 = arith.constant 0 : index
    %c0_11 = arith.constant 0 : index
    %15 = vector.load %arg6[%c0_10, %c0_11] : memref<128x32xbf16, #tpu.memory_space<vmem>>, vector<128x32xbf16>
    %c0_12 = arith.constant 0 : index
    %c0_13 = arith.constant 0 : index
    %16 = vector.load %arg7[%c0_12, %c0_13] : memref<1x32xf32, #tpu.memory_space<vmem>>, vector<1x32xf32>
    %cst_14 = arith.constant dense<0.000000e+00> : vector<8x32xf32>
    %17 = tpu.matmul %14, %15, %cst_14 {dimension_numbers = #tpu.dot_dimension_numbers<[1], [0], [0], [1], [0, 0, 1, 1], [], []>} : vector<8x128xbf16>, vector<128x32xbf16>, vector<8x32xf32> -> vector<8x32xf32>
    %18 = vector.broadcast %16 : vector<1x32xf32> to vector<8x32xf32>
    %19 = arith.addf %17, %18 : vector<8x32xf32>
    %20 = vector.extract_strided_slice %19 {offsets = [0, 0], sizes = [8, 16], strides = [1, 1]} : vector<8x32xf32> to vector<8x16xf32>
    %c0_15 = arith.constant 0 : index
    %c0_16 = arith.constant 0 : index
    %21 = vector.load %arg10[%c0_15, %c0_16] : memref<8x16xf32, #tpu.memory_space<vmem>>, vector<8x16xf32>
    tpu.vector_store %arg10[%c0_15, %c0_16], %20 {strides = array<i32>} : memref<8x16xf32, #tpu.memory_space<vmem>>, vector<8x16xf32>,
    %22 = vector.extract_strided_slice %19 {offsets = [0, 16], sizes = [8, 16], strides = [1, 1]} : vector<8x32xf32> to vector<8x16xf32>
    %c0_17 = arith.constant 0 : index
    %c0_18 = arith.constant 0 : index
    %23 = vector.load %arg8[%c0_17, %c0_18] : memref<1x16xf32, #tpu.memory_space<vmem>>, vector<1x16xf32>
    %c0_19 = arith.constant 0 : index
    %c0_20 = arith.constant 0 : index
    %24 = vector.load %arg9[%c0_19, %c0_20] : memref<1x16xf32, #tpu.memory_space<vmem>>, vector<1x16xf32>
    %25 = vector.broadcast %23 : vector<1x16xf32> to vector<8x16xf32>
    %26 = arith.subf %25, %22 : vector<8x16xf32>
    %cst_21 = arith.constant 0.000000e+00 : f32
    %27 = vector.broadcast %cst_21 : f32 to vector<8x16xf32>
    %28 = arith.maximumf %26, %27 : vector<8x16xf32>
    %29 = vector.broadcast %cst_21 : f32 to vector<8x16xf32>
    %30 = arith.subf %26, %29 : vector<8x16xf32>
    %31 = arith.cmpf one, %30, %30 : vector<8x16xf32>
    %32 = vector.broadcast %cst_21 : f32 to vector<8x16xf32>
    %33 = arith.addf %26, %32 : vector<8x16xf32>
    %34 = math.absf %30 : vector<8x16xf32>
    %cst_22 = arith.constant 0.000000e+00 : f32
    %35 = vector.broadcast %cst_22 : f32 to vector<8x16xf32>
    %36 = arith.subf %35, %34 : vector<8x16xf32>
    %37 = math.exp %36 : vector<8x16xf32>
    %38 = math.log1p %37 : vector<8x16xf32>
    %39 = arith.addf %28, %38 : vector<8x16xf32>
    %40 = arith.select %31, %33, %39 : vector<8x16xi1>, vector<8x16xf32>
    %41 = vector.broadcast %23 : vector<1x16xf32> to vector<8x16xf32>
    %42 = arith.subf %41, %40 : vector<8x16xf32>
    %43 = vector.broadcast %24 : vector<1x16xf32> to vector<8x16xf32>
    %44 = arith.subf %42, %43 : vector<8x16xf32>
    %cst_23 = arith.constant 0.000000e+00 : f32
    %45 = vector.broadcast %cst_23 : f32 to vector<8x16xf32>
    %46 = arith.maximumf %44, %45 : vector<8x16xf32>
    %47 = vector.broadcast %cst_23 : f32 to vector<8x16xf32>
    %48 = arith.subf %44, %47 : vector<8x16xf32>
    %49 = arith.cmpf one, %48, %48 : vector<8x16xf32>
    %50 = vector.broadcast %cst_23 : f32 to vector<8x16xf32>
    %51 = arith.addf %44, %50 : vector<8x16xf32>
    %52 = math.absf %48 : vector<8x16xf32>
    %cst_24 = arith.constant 0.000000e+00 : f32
    %53 = vector.broadcast %cst_24 : f32 to vector<8x16xf32>
    %54 = arith.subf %53, %52 : vector<8x16xf32>
    %55 = math.exp %54 : vector<8x16xf32>
    %56 = math.log1p %55 : vector<8x16xf32>
    %57 = arith.addf %46, %56 : vector<8x16xf32>
    %58 = arith.select %49, %51, %57 : vector<8x16xi1>, vector<8x16xf32>
    %59 = vector.broadcast %24 : vector<1x16xf32> to vector<8x16xf32>
    %60 = arith.addf %59, %58 : vector<8x16xf32>
    %61 = math.exp %60 : vector<8x16xf32>
    %c0_25 = arith.constant 0 : index
    %c0_26 = arith.constant 0 : index
    %62 = vector.load %arg11[%c0_25, %c0_26] : memref<8x16xf32, #tpu.memory_space<vmem>>, vector<8x16xf32>
    tpu.vector_store %arg11[%c0_25, %c0_26], %61 {strides = array<i32>} : memref<8x16xf32, #tpu.memory_space<vmem>>, vector<8x16xf32>,
    return
  }
  func.func @transform_0(%arg0: i32) -> (i32, i32) {
    %c0_i32 = arith.constant 0 : i32
    %c0_i32_0 = arith.constant 0 : i32
    return %arg0, %c0_i32 : i32, i32
  }
  func.func @transform_1(%arg0: i32) -> (i32, i32) {
    %c0_i32 = arith.constant 0 : i32
    %c0_i32_0 = arith.constant 0 : i32
    %c0_i32_1 = arith.constant 0 : i32
    return %c0_i32, %c0_i32_0 : i32, i32
  }
  func.func @transform_2(%arg0: i32) -> (i32, i32) {
    %c0_i32 = arith.constant 0 : i32
    %c0_i32_0 = arith.constant 0 : i32
    %c0_i32_1 = arith.constant 0 : i32
    return %c0_i32, %c0_i32_0 : i32, i32
  }
  func.func @transform_3(%arg0: i32) -> (i32, i32) {
    %c0_i32 = arith.constant 0 : i32
    %c0_i32_0 = arith.constant 0 : i32
    %c0_i32_1 = arith.constant 0 : i32
    return %c0_i32, %c0_i32_0 : i32, i32
  }
  func.func @transform_4(%arg0: i32) -> (i32, i32) {
    %c0_i32 = arith.constant 0 : i32
    %c0_i32_0 = arith.constant 0 : i32
    %c0_i32_1 = arith.constant 0 : i32
    return %c0_i32, %c0_i32_0 : i32, i32
  }
  func.func @transform_5(%arg0: i32) -> (i32, i32) {
    %c0_i32 = arith.constant 0 : i32
    %c0_i32_0 = arith.constant 0 : i32
    %c0_i32_1 = arith.constant 0 : i32
    return %c0_i32, %c0_i32_0 : i32, i32
  }
  func.func @transform_6(%arg0: i32) -> (i32, i32) {
    %c0_i32 = arith.constant 0 : i32
    %c0_i32_0 = arith.constant 0 : i32
    %c0_i32_1 = arith.constant 0 : i32
    return %c0_i32, %c0_i32_0 : i32, i32
  }
  func.func @transform_7(%arg0: i32) -> (i32, i32) {
    %c0_i32 = arith.constant 0 : i32
    %c0_i32_0 = arith.constant 0 : i32
    %c0_i32_1 = arith.constant 0 : i32
    return %c0_i32, %c0_i32_0 : i32, i32
  }
  func.func @transform_8(%arg0: i32) -> (i32, i32) {
    %c0_i32 = arith.constant 0 : i32
    %c0_i32_0 = arith.constant 0 : i32
    %c0_i32_1 = arith.constant 0 : i32
    return %c0_i32, %c0_i32_0 : i32, i32
  }
  func.func @transform_9(%arg0: i32) -> (i32, i32) {
    %c0_i32 = arith.constant 0 : i32
    %c0_i32_0 = arith.constant 0 : i32
    return %arg0, %c0_i32 : i32, i32
  }
  func.func @transform_10(%arg0: i32) -> (i32, i32) {
    %c0_i32 = arith.constant 0 : i32
    %c0_i32_0 = arith.constant 0 : i32
    return %arg0, %c0_i32 : i32, i32
  }
}

</mosaic_0001>

<bundles_post_ra>
// kernel: tpu_custom_call.1
= control target key start
LH: loop header
LB: loop body
LE: loop exit
PB: predicated region body
PF: predicated region fallthrough
CT: control target
= control target key end

     0   :  { %16 = vsyncpa [#allocation3], 0  ;;  %v596_v1 = vmov 0.0   ;;  %vm597_vm0 = vmmov 0   ;;  %vm61_vm1 = vcmask 261120   ;;  %s760_s0 = inlined_call_operand.vmem [shape: bf16[8,32], index: 0, kind: input, shape index: {}]   ;;  %s761_s1 = inlined_call_operand.vmem [shape: bf16[32,128], index: 1, kind: input, shape index: {}]   ;;  %s762_s2 = inlined_call_operand.vmem [shape: f32[1,128], index: 2, kind: input, shape index: {}]   ;;  %s763_s3 = inlined_call_operand.vmem [shape: bf16[128,128], index: 3, kind: input, shape index: {}]   ;;  %s764_s4 = inlined_call_operand.vmem [shape: f32[1,128], index: 4, kind: input, shape index: {}]   ;;  %s765_s5 = inlined_call_operand.vmem [shape: bf16[128,32], index: 5, kind: input, shape index: {}]   ;;  %s766_s6 = inlined_call_operand.vmem [shape: f32[1,32], index: 6, kind: input, shape index: {}]   ;;  %s767_s7 = inlined_call_operand.vmem [shape: f32[1,16], index: 7, kind: input, shape index: {}]   ;;  %s768_s8 = inlined_call_operand.vmem [shape: f32[1,16], index: 8, kind: input, shape index: {}]   ;;  %s769_s9 = inlined_call_operand.hbm [shape: f32[8,16], index: 9, kind: output, shape index: {0}]   ;;  %s770_s10 = inlined_call_operand.hbm [shape: f32[8,16], index: 10, kind: output, shape index: {1}]  }
   0x1   :  { %v520_v0 = vld [vmem:[%s761_s1 + $0x8] sm:$0xff]   ;;  %467 = vmatprep.subr.bf16.mxu0 %v596_v1  ;;  %475 = vmatprep.subr.bf16.mxu1 %v596_v1  ;;  %v521_v2 = vld [vmem:[%s761_s1] sm:$0xff]   ;;  %v522_v3 = vld [vmem:[%s763_s3 + $0x38] sm:$0xff]  }
   0x2   :  { %468 = vmatpush3.bf16.msra.mxu0 %v520_v0  ;;  %471 = vmatprep.mubr.msk.bf16.mxu0 %vm597_vm0, %v596_v1  ;;  %v523_v4 = vld [vmem:[%s763_s3 + $0x30] sm:$0xff]   ;;  %v37_v5 = vld [vmem:[%s760_s0] sm:$0xf]  ;;  %v524_v6 = vld [vmem:[%s763_s3 + $0x28] sm:$0xff]  }
   0x3   :  { %469 = vmatprep.subr.bf16.mxu0 %v596_v1  ;;  %491 = vmatprep.mubr.msk.bf16.mxu1 %vm597_vm0, %v596_v1 }
   0x4   :  { %476 = vmatpush3.bf16.msra.mxu1 %v522_v3 }
   0x5   :  { %477 = vmatprep.subr.bf16.mxu1 %v596_v1 }
   0x6   :  { %470 = vmatpush3.bf16.msra.mxu0 %v521_v2 }
   0x7   :  { %495 = vmatprep.subr.bf16.mxu0 %v596_v1 }
   0x8   :  { %478 = vmatpush3.bf16.msra.mxu1 %v523_v4 }
   0x9   :  { %472 = vmatmul.mubr.msk.bf16.vlgmr.msra.gmra.mxu0 %vm61_vm1, %v37_v5  ;;  %479 = vmatprep.subr.bf16.mxu1 %v596_v1 }
   0xa   :  { %511 = vmatprep.mubr.msk.bf16.mxu0 %vm597_vm0, %v596_v1 }
   0xc   :  { %480 = vmatpush3.bf16.msra.mxu1 %v524_v6 }
   0xd   :  { %481 = vmatprep.subr.bf16.mxu1 %v596_v1 }
   0xe   :  { %17 = vsyncpa [#allocation5], 0  ;;  %v525_v7 = vld [vmem:[%s763_s3 + $0x20] sm:$0xff]   ;;  %v526_v8 = vld [vmem:[%s763_s3 + $0x18] sm:$0xff]   ;;  %vm331_vm2 = vcmask 130048  }
   0xf   :  { %v527_v9 = vld [vmem:[%s763_s3 + $0x10] sm:$0xff]   ;;  %v528_v10 = vld [vmem:[%s763_s3 + $0x8] sm:$0xff]   ;;  %v529_v11 = vld [vmem:[%s763_s3] sm:$0xff]  }
  0x10   :  { %482 = vmatpush3.bf16.msra.mxu1 %v525_v7  ;;  %v530_v12 = vld [vmem:[%s765_s5 + $0x38] sm:$0xff]   ;;  %v531_v13 = vld [vmem:[%s765_s5 + $0x30] sm:$0xff]   ;;  %v532_v14 = vld [vmem:[%s765_s5 + $0x28] sm:$0xff]  }
  0x11   :  { %483 = vmatprep.subr.bf16.mxu1 %v596_v1  ;;  %496 = vmatpush3.bf16.msra.mxu0 %v530_v12  ;;  %v422_v15 = vld [vmem:[%s762_s2] ss:$0 sm:$0xff]  ;;  %v534_v24 = vld [vmem:[%s765_s5 + $0x18] sm:$0xff]   ;;  %v535_v25 = vld [vmem:[%s765_s5 + $0x10] sm:$0xff]  }
  0x12   :  { %497 = vmatprep.subr.bf16.mxu0 %v596_v1  ;;  %v533_v23 = vld [vmem:[%s765_s5 + $0x20] sm:$0xff]   ;;  %v536_v26 = vld [vmem:[%s765_s5 + $0x8] sm:$0xff]  }
  0x13   :  { %v537_v27 = vld [vmem:[%s765_s5] sm:$0xff]   ;;  %s598_s5 = smov 112  }
  0x14   :  { %484 = vmatpush3.bf16.msra.mxu1 %v526_v8  ;;  %v426_v28 = vld [vmem:[%s764_s4] ss:$0 sm:$0xff]  ;;  %s599_s4 = smov [#allocation2]  }
  0x15   :  { %485 = vmatprep.subr.bf16.mxu1 %v596_v1  ;;  %498 = vmatpush3.bf16.msra.mxu0 %v531_v13  ;;  %v435_v36 = vld [vmem:[%s766_s6] ss:$0 sm:$0xff]  ;;  %s400_s11 = sshll.u32 %s599_s4, 4  ;;  %s401_s11 = int_to_ptr.vmem [resolvable:$true] %s400_s11 }
  0x16   :  { %499 = vmatprep.subr.bf16.mxu0 %v596_v1  ;;  %s552_s12 = scalar_lea.vmem %s401_s11, 128  ;;  %p557_p1 = scmp.lt.s32.totalorder %s401_s11, %s401_s11 }
  0x17   :  { %p553_p0 = scmp.ne.s32.totalorder %s401_s11, %s552_s12  ;;  %p558_p2 = scmp.lt.s32.totalorder %s552_s12, %s552_s12 }
  0x18   :  { %486 = vmatpush3.bf16.msra.mxu1 %v527_v9 }
  0x19   :  { %487 = vmatprep.subr.bf16.mxu1 %v596_v1  ;;  %500 = vmatpush3.bf16.msra.mxu0 %v532_v14  ;;  %p559_p3 = por %p558_p2, %p557_p1 }
  0x1a   :  { %501 = vmatprep.subr.bf16.mxu0 %v596_v1 }
  0x1b   :  { %p560_p4 = pnand %p559_p3, %p553_p0 }
  0x1c   :  { %488 = vmatpush3.bf16.msra.mxu1 %v528_v10 }
  0x1d   :  { %489 = vmatprep.subr.bf16.mxu1 %v596_v1  ;;  %502 = vmatpush3.bf16.msra.mxu0 %v533_v23 }
  0x1e   :  { %503 = vmatprep.subr.bf16.mxu0 %v596_v1 }
  0x20   :  { %490 = vmatpush3.bf16.msra.mxu1 %v529_v11 }
  0x21   :  { %504 = vmatpush3.bf16.msra.mxu0 %v534_v24 }
  0x22   :  { %505 = vmatprep.subr.bf16.mxu0 %v596_v1 }
  0x25   :  { %506 = vmatpush3.bf16.msra.mxu0 %v535_v25 }
  0x26   :  { %507 = vmatprep.subr.bf16.mxu0 %v596_v1 }
  0x29   :  { %508 = vmatpush3.bf16.msra.mxu0 %v536_v26 }
  0x2a   :  { %509 = vmatprep.subr.bf16.mxu0 %v596_v1 }
  0x2d   :  { %510 = vmatpush3.bf16.msra.mxu0 %v537_v27 }
  0xc9   :  { %v99_v16 = vpop.f32.mrf.mxu0 }
  0xca   :  { %v100_v17 = vadd.f32 %v422_v15, %v99_v16 }
  0xcb   :  { %v473_v18 = vpop.f32.mrf.mxu0 }
  0xcc   :  { %538 = vtanh.f32 %v100_v17 }
  0xcd   :  { %v102_v19 = vpop.f32.mrf.mxu0 }
  0xcf   :  { %v474_v20 = vpop.f32.mrf.mxu0 }
  0xd9   :  { %v539_v21 = vpop.eup %538 }
  0xda   :  { %v106_v22 = vpack.c.bf16 %v539_v21, %v539_v21 }
  0xdc   :  { %492 = vmatmul.mubr.bf16.vlgmr.msra.gmra.mxu1 %v106_v22 }
 0x19c   :  { %v212_v29 = vpop.f32.mrf.mxu1 }
 0x19d   :  { %v213_v30 = vadd.f32 %v426_v28, %v212_v29 }
 0x19e   :  { %v493_v31 = vpop.f32.mrf.mxu1 }
 0x19f   :  { %540 = vtanh.f32 %v213_v30 }
 0x1a0   :  { %v215_v32 = vpop.f32.mrf.mxu1 }
 0x1a2   :  { %v494_v33 = vpop.f32.mrf.mxu1 }
 0x1ac   :  { %v541_v34 = vpop.eup %540 }
 0x1ad   :  { %v219_v35 = vpack.c.bf16 %v541_v34, %v541_v34 }
 0x1af   :  { %512 = vmatmul.mubr.bf16.vlgmr.msra.gmra.mxu0 %v219_v35 }
 0x26f   :  { %v325_v37 = vpop.f32.mrf.mxu0 }
 0x270   :  { %v326_v38 = vadd.f32 %v435_v36, %v325_v37 }
 0x271   :  { %v513_v39 = vpop.f32.mrf.mxu0 }
 0x272   :  { %342 = vrot.lane.b32.xlu0 %v326_v38, %s598_s5  ;;  %332 = vst.msk [vmem:[#allocation2] sm:$0xff] %vm331_vm2, %v326_v38 }
 0x273   :  { %v328_v40 = vpop.f32.mrf.mxu0 }
 0x275   :  { %v514_v41 = vpop.f32.mrf.mxu0 }
 0x276   :  { %563 = shalt.err (!%p560_p4)
}
 0x277   :  { %403 = dma.vmem_to_hbm [thread:$0]  %s401_s11, 128, %s769_s9, [#allocation3]   ;;  %v444_v42 = vld [vmem:[%s767_s7] ss:$0 sm:$0xff] }
 0x278   :  { %v445_v59 = vld [vmem:[%s768_s8] ss:$0 sm:$0xff]  ;;  %s600_s8 = smov [#allocation4]  }
 0x279   :  { %s410_s16 = sshll.u32 %s600_s8, 4  ;;  %s411_s16 = int_to_ptr.vmem [resolvable:$true] %s410_s16 }
 0x27a   :  { %s572_s17 = scalar_lea.vmem %s411_s16, 128  ;;  %p577_p6 = scmp.lt.s32.totalorder %s411_s16, %s411_s16 }
 0x27b   :  { %p573_p5 = scmp.ne.s32.totalorder %s411_s16, %s572_s17  ;;  %p578_p7 = scmp.lt.s32.totalorder %s572_s17, %s572_s17 }
 0x27d   :  { %p579_p8 = por %p578_p7, %p577_p6 }
 0x27f   :  { %p580_p9 = pnand %p579_p8, %p573_p5 }
 0x2e4   :  { %v343_v43 = vpop.permute.xlu0 %342 }
 0x2e5   :  { %v345_v44 = vsub.f32 %v444_v42, %v343_v43 }
 0x2e7   :  { %v349_v45 = vand.u32 2147483647, %v345_v44  ;;  %v346_v56 = vmax.f32 %v345_v44, 0.0  ;;  %vm347_vm4 = vcmp.ne.f32.partialorder %v345_v44, %v345_v44 }
 0x2e9   :  { %v350_v46 = vsub.f32 0.0, %v349_v45 }
 0x2eb   :  { %v351_v47 = vmul.f32 1.442695, %v350_v46 }
 0x2ed   :  { %542 = vpow2.f32 %v351_v47 }
 0x2fa   :  { %v543_v48 = vpop.eup %542 }
 0x2fb   :  { %v353_v49 = vadd.f32 1.0, %v543_v48  ;;  %v356_v50 = vmul.f32 -0.5, %v543_v48  ;;  %v359_v52 = vand.u32 2147483647, %v543_v48 }
 0x2fd   :  { %544 = vlog2.f32 %v353_v49  ;;  %v357_v51 = vadd.f32 1.0, %v356_v50  ;;  %vm360_vm3 = vcmp.lt.f32.partialorder %v359_v52, 0.0004427343 }
 0x2ff   :  { %v358_v55 = vmul.f32 %v543_v48, %v357_v51 }
 0x30a   :  { %v545_v53 = vpop.eup %544 }
 0x30b   :  { %v355_v54 = vmul.f32 0.6931472, %v545_v53 }
 0x30d   :  { %v361_v57 = vsel %vm360_vm3, %v358_v55, %v355_v54 }
 0x30e   :  { %v362_v58 = vadd.f32 %v361_v57, %v346_v56 }
 0x310   :  { %v363_v60 = vsel %vm347_vm4, %v345_v44, %v362_v58 }
 0x311   :  { %v364_v61 = vsub.f32 %v444_v42, %v363_v60 }
 0x313   :  { %v371_v62 = vsub.f32 %v364_v61, %v445_v59 }
 0x315   :  { %v375_v63 = vand.u32 2147483647, %v371_v62  ;;  %v372_v10 = vmax.f32 %v371_v62, 0.0  ;;  %vm373_vm6 = vcmp.ne.f32.partialorder %v371_v62, %v371_v62 }
 0x317   :  { %v376_v0 = vsub.f32 0.0, %v375_v63 }
 0x319   :  { %v377_v1 = vmul.f32 1.442695, %v376_v0 }
 0x31b   :  { %546 = vpow2.f32 %v377_v1 }
 0x328   :  { %v547_v2 = vpop.eup %546 }
 0x329   :  { %v379_v3 = vadd.f32 1.0, %v547_v2  ;;  %v382_v4 = vmul.f32 -0.5, %v547_v2  ;;  %v385_v6 = vand.u32 2147483647, %v547_v2 }
 0x32b   :  { %548 = vlog2.f32 %v379_v3  ;;  %v383_v5 = vadd.f32 1.0, %v382_v4  ;;  %vm386_vm5 = vcmp.lt.f32.partialorder %v385_v6, 0.0004427343 }
 0x32d   :  { %v384_v9 = vmul.f32 %v547_v2, %v383_v5 }
 0x338   :  { %v549_v7 = vpop.eup %548 }
 0x339   :  { %v381_v8 = vmul.f32 0.6931472, %v549_v7 }
 0x33b   :  { %v387_v11 = vsel %vm386_vm5, %v384_v9, %v381_v8 }
 0x33c   :  { %v388_v12 = vadd.f32 %v387_v11, %v372_v10 }
 0x33e   :  { %v389_v13 = vsel %vm373_vm6, %v371_v62, %v388_v12 }
 0x33f   :  { %v390_v14 = vadd.f32 %v445_v59, %v389_v13 }
 0x341   :  { %v391_v15 = vmul.f32 1.442695, %v390_v14 }
 0x343   :  { %550 = vpow2.f32 %v391_v15 }
 0x350   :  { %v551_v16 = vpop.eup %550 }
 0x351   :  { %393 = vst.msk [vmem:[#allocation4] sm:$0xff] %vm331_vm2, %v551_v16 }
 0x352   :  { %583 = shalt.err (!%p580_p9)
}
 0x353   :  { %413 = dma.vmem_to_hbm [thread:$0]  %s411_s16, 128, %s770_s10, [#allocation5]  }
 0x354   :  { %592 = dma.done.wait [#allocation3], 128  }
 0x355   :  { %593 = vsyncadd [#allocation3], 4294967168 }
 0x356   :  { %594 = dma.done.wait [#allocation5], 128  }
 0x357   :  { %595 = vsyncadd [#allocation5], 4294967168 }
 0x358   :  { %420 = vsyncpa [#allocation3], 1 }
 0x359   :  { %421 = vsyncpa [#allocation5], 1 }

// kernel: tpu_custom_call.1
= control target key start
LH: loop header
LB: loop body
LE: loop exit
PB: predicated region body
PF: predicated region fallthrough
CT: control target
= control target key end

     0   :  { %16 = vsyncpa [#allocation3], 0  ;;  %v596_v1 = vmov 0.0   ;;  %vm597_vm0 = vmmov 0   ;;  %vm61_vm1 = vcmask 261120   ;;  %s760_s0 = inlined_call_operand.vmem [shape: bf16[8,32], index: 0, kind: input, shape index: {}]   ;;  %s761_s1 = inlined_call_operand.vmem [shape: bf16[32,128], index: 1, kind: input, shape index: {}]   ;;  %s762_s2 = inlined_call_operand.vmem [shape: f32[1,128], index: 2, kind: input, shape index: {}]   ;;  %s763_s3 = inlined_call_operand.vmem [shape: bf16[128,128], index: 3, kind: input, shape index: {}]   ;;  %s764_s4 = inlined_call_operand.vmem [shape: f32[1,128], index: 4, kind: input, shape index: {}]   ;;  %s765_s5 = inlined_call_operand.vmem [shape: bf16[128,32], index: 5, kind: input, shape index: {}]   ;;  %s766_s6 = inlined_call_operand.vmem [shape: f32[1,32], index: 6, kind: input, shape index: {}]   ;;  %s767_s7 = inlined_call_operand.vmem [shape: f32[1,16], index: 7, kind: input, shape index: {}]   ;;  %s768_s8 = inlined_call_operand.vmem [shape: f32[1,16], index: 8, kind: input, shape index: {}]   ;;  %s769_s9 = inlined_call_operand.hbm [shape: f32[8,16], index: 9, kind: output, shape index: {0}]   ;;  %s770_s10 = inlined_call_operand.hbm [shape: f32[8,16], index: 10, kind: output, shape index: {1}]  }
   0x1   :  { %v520_v0 = vld [vmem:[%s761_s1 + $0x8] sm:$0xff]   ;;  %467 = vmatprep.subr.bf16.mxu0 %v596_v1  ;;  %475 = vmatprep.subr.bf16.mxu1 %v596_v1  ;;  %v521_v2 = vld [vmem:[%s761_s1] sm:$0xff]   ;;  %v522_v3 = vld [vmem:[%s763_s3 + $0x38] sm:$0xff]  }
   0x2   :  { %468 = vmatpush3.bf16.msra.mxu0 %v520_v0  ;;  %471 = vmatprep.mubr.msk.bf16.mxu0 %vm597_vm0, %v596_v1  ;;  %v523_v4 = vld [vmem:[%s763_s3 + $0x30] sm:$0xff]   ;;  %v37_v5 = vld [vmem:[%s760_s0] sm:$0xf]  ;;  %v524_v6 = vld [vmem:[%s763_s3 + $0x28] sm:$0xff]  }
   0x3   :  { %469 = vmatprep.subr.bf16.mxu0 %v596_v1  ;;  %491 = vmatprep.mubr.msk.bf16.mxu1 %vm597_vm0, %v596_v1 }
   0x4   :  { %476 = vmatpush3.bf16.msra.mxu1 %v522_v3 }
   0x5   :  { %477 = vmatprep.subr.bf16.mxu1 %v596_v1 }
   0x6   :  { %470 = vmatpush3.bf16.msra.mxu0 %v521_v2 }
   0x7   :  { %495 = vmatprep.subr.bf16.mxu0 %v596_v1 }
   0x8   :  { %478 = vmatpush3.bf16.msra.mxu1 %v523_v4 }
   0x9   :  { %472 = vmatmul.mubr.msk.bf16.vlgmr.msra.gmra.mxu0 %vm61_vm1, %v37_v5  ;;  %479 = vmatprep.subr.bf16.mxu1 %v596_v1 }
   0xa   :  { %511 = vmatprep.mubr.msk.bf16.mxu0 %vm597_vm0, %v596_v1 }
   0xc   :  { %480 = vmatpush3.bf16.msra.mxu1 %v524_v6 }
   0xd   :  { %481 = vmatprep.subr.bf16.mxu1 %v596_v1 }
   0xe   :  { %17 = vsyncpa [#allocation5], 0  ;;  %v525_v7 = vld [vmem:[%s763_s3 + $0x20] sm:$0xff]   ;;  %v526_v8 = vld [vmem:[%s763_s3 + $0x18] sm:$0xff]   ;;  %vm331_vm2 = vcmask 130048  }
   0xf   :  { %v527_v9 = vld [vmem:[%s763_s3 + $0x10] sm:$0xff]   ;;  %v528_v10 = vld [vmem:[%s763_s3 + $0x8] sm:$0xff]   ;;  %v529_v11 = vld [vmem:[%s763_s3] sm:$0xff]  }
  0x10   :  { %482 = vmatpush3.bf16.msra.mxu1 %v525_v7  ;;  %v530_v12 = vld [vmem:[%s765_s5 + $0x38] sm:$0xff]   ;;  %v531_v13 = vld [vmem:[%s765_s5 + $0x30] sm:$0xff]   ;;  %v532_v14 = vld [vmem:[%s765_s5 + $0x28] sm:$0xff]  }
  0x11   :  { %483 = vmatprep.subr.bf16.mxu1 %v596_v1  ;;  %496 = vmatpush3.bf16.msra.mxu0 %v530_v12  ;;  %v422_v15 = vld [vmem:[%s762_s2] ss:$0 sm:$0xff]  ;;  %v534_v24 = vld [vmem:[%s765_s5 + $0x18] sm:$0xff]   ;;  %v535_v25 = vld [vmem:[%s765_s5 + $0x10] sm:$0xff]  }
  0x12   :  { %497 = vmatprep.subr.bf16.mxu0 %v596_v1  ;;  %v533_v23 = vld [vmem:[%s765_s5 + $0x20] sm:$0xff]   ;;  %v536_v26 = vld [vmem:[%s765_s5 + $0x8] sm:$0xff]  }
  0x13   :  { %v537_v27 = vld [vmem:[%s765_s5] sm:$0xff]   ;;  %s598_s5 = smov 112  }
  0x14   :  { %484 = vmatpush3.bf16.msra.mxu1 %v526_v8  ;;  %v426_v28 = vld [vmem:[%s764_s4] ss:$0 sm:$0xff]  ;;  %s599_s4 = smov [#allocation2]  }
  0x15   :  { %485 = vmatprep.subr.bf16.mxu1 %v596_v1  ;;  %498 = vmatpush3.bf16.msra.mxu0 %v531_v13  ;;  %v435_v36 = vld [vmem:[%s766_s6] ss:$0 sm:$0xff]  ;;  %s400_s11 = sshll.u32 %s599_s4, 4  ;;  %s401_s11 = int_to_ptr.vmem [resolvable:$true] %s400_s11 }
  0x16   :  { %499 = vmatprep.subr.bf16.mxu0 %v596_v1  ;;  %s552_s12 = scalar_lea.vmem %s401_s11, 128  ;;  %p557_p1 = scmp.lt.s32.totalorder %s401_s11, %s401_s11 }
  0x17   :  { %p553_p0 = scmp.ne.s32.totalorder %s401_s11, %s552_s12  ;;  %p558_p2 = scmp.lt.s32.totalorder %s552_s12, %s552_s12 }
  0x18   :  { %486 = vmatpush3.bf16.msra.mxu1 %v527_v9 }
  0x19   :  { %487 = vmatprep.subr.bf16.mxu1 %v596_v1  ;;  %500 = vmatpush3.bf16.msra.mxu0 %v532_v14  ;;  %p559_p3 = por %p558_p2, %p557_p1 }
  0x1a   :  { %501 = vmatprep.subr.bf16.mxu0 %v596_v1 }
  0x1b   :  { %p560_p4 = pnand %p559_p3, %p553_p0 }
  0x1c   :  { %488 = vmatpush3.bf16.msra.mxu1 %v528_v10 }
  0x1d   :  { %489 = vmatprep.subr.bf16.mxu1 %v596_v1  ;;  %502 = vmatpush3.bf16.msra.mxu0 %v533_v23 }
  0x1e   :  { %503 = vmatprep.subr.bf16.mxu0 %v596_v1 }
  0x20   :  { %490 = vmatpush3.bf16.msra.mxu1 %v529_v11 }
  0x21   :  { %504 = vmatpush3.bf16.msra.mxu0 %v534_v24 }
  0x22   :  { %505 = vmatprep.subr.bf16.mxu0 %v596_v1 }
  0x25   :  { %506 = vmatpush3.bf16.msra.mxu0 %v535_v25 }
  0x26   :  { %507 = vmatprep.subr.bf16.mxu0 %v596_v1 }
  0x29   :  { %508 = vmatpush3.bf16.msra.mxu0 %v536_v26 }
  0x2a   :  { %509 = vmatprep.subr.bf16.mxu0 %v596_v1 }
  0x2d   :  { %510 = vmatpush3.bf16.msra.mxu0 %v537_v27 }
  0xc9   :  { %v99_v16 = vpop.f32.mrf.mxu0 }
  0xca   :  { %v100_v17 = vadd.f32 %v422_v15, %v99_v16 }
  0xcb   :  { %v473_v18 = vpop.f32.mrf.mxu0 }
  0xcc   :  { %538 = vtanh.f32 %v100_v17 }
  0xcd   :  { %v102_v19 = vpop.f32.mrf.mxu0 }
  0xcf   :  { %v474_v20 = vpop.f32.mrf.mxu0 }
  0xd9   :  { %v539_v21 = vpop.eup %538 }
  0xda   :  { %v106_v22 = vpack.c.bf16 %v539_v21, %v539_v21 }
  0xdc   :  { %492 = vmatmul.mubr.bf16.vlgmr.msra.gmra.mxu1 %v106_v22 }
 0x19c   :  { %v212_v29 = vpop.f32.mrf.mxu1 }
 0x19d   :  { %v213_v30 = vadd.f32 %v426_v28, %v212_v29 }
 0x19e   :  { %v493_v31 = vpop.f32.mrf.mxu1 }
 0x19f   :  { %540 = vtanh.f32 %v213_v30 }
 0x1a0   :  { %v215_v32 = vpop.f32.mrf.mxu1 }
 0x1a2   :  { %v494_v33 = vpop.f32.mrf.mxu1 }
 0x1ac   :  { %v541_v34 = vpop.eup %540 }
 0x1ad   :  { %v219_v35 = vpack.c.bf16 %v541_v34, %v541_v34 }
 0x1af   :  { %512 = vmatmul.mubr.bf16.vlgmr.msra.gmra.mxu0 %v219_v35 }
 0x26f   :  { %v325_v37 = vpop.f32.mrf.mxu0 }
 0x270   :  { %v326_v38 = vadd.f32 %v435_v36, %v325_v37 }
 0x271   :  { %v513_v39 = vpop.f32.mrf.mxu0 }
 0x272   :  { %342 = vrot.lane.b32.xlu0 %v326_v38, %s598_s5  ;;  %332 = vst.msk [vmem:[#allocation2] sm:$0xff] %vm331_vm2, %v326_v38 }
 0x273   :  { %v328_v40 = vpop.f32.mrf.mxu0 }
 0x275   :  { %v514_v41 = vpop.f32.mrf.mxu0 }
 0x276   :  { %563 = shalt.err (!%p560_p4)
}
 0x277   :  { %403 = dma.vmem_to_hbm [thread:$0]  %s401_s11, 128, %s769_s9, [#allocation3]   ;;  %v444_v42 = vld [vmem:[%s767_s7] ss:$0 sm:$0xff] }
 0x278   :  { %v445_v59 = vld [vmem:[%s768_s8] ss:$0 sm:$0xff]  ;;  %s600_s8 = smov [#allocation4]  }
 0x279   :  { %s410_s16 = sshll.u32 %s600_s8, 4  ;;  %s411_s16 = int_to_ptr.vmem [resolvable:$true] %s410_s16 }
 0x27a   :  { %s572_s17 = scalar_lea.vmem %s411_s16, 128  ;;  %p577_p6 = scmp.lt.s32.totalorder %s411_s16, %s411_s16 }
 0x27b   :  { %p573_p5 = scmp.ne.s32.totalorder %s411_s16, %s572_s17  ;;  %p578_p7 = scmp.lt.s32.totalorder %s572_s17, %s572_s17 }
 0x27d   :  { %p579_p8 = por %p578_p7, %p577_p6 }
 0x27f   :  { %p580_p9 = pnand %p579_p8, %p573_p5 }
 0x2e4   :  { %v343_v43 = vpop.permute.xlu0 %342 }
 0x2e5   :  { %v345_v44 = vsub.f32 %v444_v42, %v343_v43 }
 0x2e7   :  { %v349_v45 = vand.u32 2147483647, %v345_v44  ;;  %v346_v56 = vmax.f32 %v345_v44, 0.0  ;;  %vm347_vm4 = vcmp.ne.f32.partialorder %v345_v44, %v345_v44 }
 0x2e9   :  { %v350_v46 = vsub.f32 0.0, %v349_v45 }
 0x2eb   :  { %v351_v47 = vmul.f32 1.442695, %v350_v46 }
 0x2ed   :  { %542 = vpow2.f32 %v351_v47 }
 0x2fa   :  { %v543_v48 = vpop.eup %542 }
 0x2fb   :  { %v353_v49 = vadd.f32 1.0, %v543_v48  ;;  %v356_v50 = vmul.f32 -0.5, %v543_v48  ;;  %v359_v52 = vand.u32 2147483647, %v543_v48 }
 0x2fd   :  { %544 = vlog2.f32 %v353_v49  ;;  %v357_v51 = vadd.f32 1.0, %v356_v50  ;;  %vm360_vm3 = vcmp.lt.f32.partialorder %v359_v52, 0.0004427343 }
 0x2ff   :  { %v358_v55 = vmul.f32 %v543_v48, %v357_v51 }
 0x30a   :  { %v545_v53 = vpop.eup %544 }
 0x30b   :  { %v355_v54 = vmul.f32 0.6931472, %v545_v53 }
 0x30d   :  { %v361_v57 = vsel %vm360_vm3, %v358_v55, %v355_v54 }
 0x30e   :  { %v362_v58 = vadd.f32 %v361_v57, %v346_v56 }
 0x310   :  { %v363_v60 = vsel %vm347_vm4, %v345_v44, %v362_v58 }
 0x311   :  { %v364_v61 = vsub.f32 %v444_v42, %v363_v60 }
 0x313   :  { %v371_v62 = vsub.f32 %v364_v61, %v445_v59 }
 0x315   :  { %v375_v63 = vand.u32 2147483647, %v371_v62  ;;  %v372_v10 = vmax.f32 %v371_v62, 0.0  ;;  %vm373_vm6 = vcmp.ne.f32.partialorder %v371_v62, %v371_v62 }
 0x317   :  { %v376_v0 = vsub.f32 0.0, %v375_v63 }
 0x319   :  { %v377_v1 = vmul.f32 1.442695, %v376_v0 }
 0x31b   :  { %546 = vpow2.f32 %v377_v1 }
 0x328   :  { %v547_v2 = vpop.eup %546 }
 0x329   :  { %v379_v3 = vadd.f32 1.0, %v547_v2  ;;  %v382_v4 = vmul.f32 -0.5, %v547_v2  ;;  %v385_v6 = vand.u32 2147483647, %v547_v2 }
 0x32b   :  { %548 = vlog2.f32 %v379_v3  ;;  %v383_v5 = vadd.f32 1.0, %v382_v4  ;;  %vm386_vm5 = vcmp.lt.f32.partialorder %v385_v6, 0.0004427343 }
 0x32d   :  { %v384_v9 = vmul.f32 %v547_v2, %v383_v5 }
 0x338   :  { %v549_v7 = vpop.eup %548 }
 0x339   :  { %v381_v8 = vmul.f32 0.6931472, %v549_v7 }
 0x33b   :  { %v387_v11 = vsel %vm386_vm5, %v384_v9, %v381_v8 }
 0x33c   :  { %v388_v12 = vadd.f32 %v387_v11, %v372_v10 }
 0x33e   :  { %v389_v13 = vsel %vm373_vm6, %v371_v62, %v388_v12 }
 0x33f   :  { %v390_v14 = vadd.f32 %v445_v59, %v389_v13 }
 0x341   :  { %v391_v15 = vmul.f32 1.442695, %v390_v14 }
 0x343   :  { %550 = vpow2.f32 %v391_v15 }
 0x350   :  { %v551_v16 = vpop.eup %550 }
 0x351   :  { %393 = vst.msk [vmem:[#allocation4] sm:$0xff] %vm331_vm2, %v551_v16 }
 0x352   :  { %583 = shalt.err (!%p580_p9)
}
 0x353   :  { %413 = dma.vmem_to_hbm [thread:$0]  %s411_s16, 128, %s770_s10, [#allocation5]  }
 0x354   :  { %592 = dma.done.wait [#allocation3], 128  }
 0x355   :  { %593 = vsyncadd [#allocation3], 4294967168 }
 0x356   :  { %594 = dma.done.wait [#allocation5], 128  }
 0x357   :  { %595 = vsyncadd [#allocation5], 4294967168 }
 0x358   :  { %420 = vsyncpa [#allocation3], 1 }
 0x359   :  { %421 = vsyncpa [#allocation5], 1 }

</bundles_post_ra>
